<compile_context>
chip_gen: v7x
topology: tpu7x:2x2x1
jax: 0.10.0
libtpu: 0.0.40
codegen_flags: <defaults>
</compile_context>

<pallas_src>
import jax
import jax.numpy as jnp
from jax.experimental import pallas as pl
from jax.experimental.pallas import tpu as pltpu


def identity(x: jax.Array) -> jax.Array:
    """Identity.forward(x) = x.  No kernel, no HBM traffic — the optimum."""
    return x


def _chunk_bounds(dim0: int, n_chunks: int):
    """Static (start, size) chunks of the leading dimension."""
    base, rem = divmod(dim0, n_chunks)
    bounds, start = [], 0
    for c in range(n_chunks):
        size = base + (1 if c < rem else 0)
        if size > 0:
            bounds.append((start, size))
            start += size
    return bounds


def _make_dma_identity_kernel(chunk_bounds):
    """HBM->HBM copy kernel.  chunk_bounds=None -> one full-array DMA."""
    if chunk_bounds is None:
        def kernel(x_hbm, o_hbm, sems):
            cp = pltpu.make_async_copy(x_hbm, o_hbm, sems.at[0])
            cp.start()
            cp.wait()
        return kernel

    def kernel(x_hbm, o_hbm, sems):
        # Start every chunk first (multiple DMA descriptors in flight), then
        # wait on all of them.  Chunk boundaries are static Python ints.
        copies = []
        for c, (start, size) in enumerate(chunk_bounds):
            cp = pltpu.make_async_copy(
                x_hbm.at[pl.ds(start, size)],
                o_hbm.at[pl.ds(start, size)],
                sems.at[c],
            )
            cp.start()
            copies.append(cp)
        for cp in copies:
            cp.wait()
    return kernel


def identity_pallas(x: jax.Array,
                    *,
                    max_inflight_copies: int = 4,
                    min_bytes_per_chunk: int = 4 << 20,
                    skip_kernel_below_bytes: int = 0) -> jax.Array:
    """Materialized identity copy via direct HBM->HBM DMA.

    - No VMEM staging, no tiling, no padding/reshape/slice wrappers: works for
      any shape and dtype at exactly 2N bytes of HBM traffic.
    - No input_output_aliases: the result is a genuinely independent buffer
      (if aliasing were acceptable, identity() returning x is strictly better).
    - For large arrays the leading dimension is split into up to
      `max_inflight_copies` chunks (each >= `min_bytes_per_chunk`) with one DMA
      semaphore per chunk so several transfers overlap.
    - `skip_kernel_below_bytes` lets callers bypass the kernel launch for tiny
      activations where launch cost dwarfs the copy (default 0 so the kernel is
      always exercised here).
    """
    if x.size == 0:
        return x
    if x.nbytes <= skip_kernel_below_bytes:
        # Launch + pipeline setup cost dwarfs a few-KiB copy; let XLA copy it.
        return jnp.copy(x)

    # Decide how many concurrent DMA chunks to issue (all static at trace time).
    n_chunks = 1
    if x.ndim >= 1 and x.shape[0] >= 2:
        by_size = max(1, x.nbytes // max(1, min_bytes_per_chunk))
        n_chunks = int(min(max_inflight_copies, x.shape[0], by_size))
    chunk_bounds = _chunk_bounds(x.shape[0], n_chunks) if n_chunks > 1 else None
    n_sems = len(chunk_bounds) if chunk_bounds is not None else 1

    kernel = _make_dma_identity_kernel(chunk_bounds)

    return pl.pallas_call(
        kernel,
        out_shape=jax.ShapeDtypeStruct(x.shape, x.dtype),
        in_specs=[pl.BlockSpec(memory_space=pl.ANY)],   # raw HBM ref, no auto-DMA
        out_specs=pl.BlockSpec(memory_space=pl.ANY),    # raw HBM ref, written by DMA
        scratch_shapes=[pltpu.SemaphoreType.DMA((n_sems,))],
    )(x)


if __name__ == "__main__":
    key = jax.random.PRNGKey(0)

    # Small NCHW input consistent with the module's usage in a ResNet-style net.
    x = jax.random.normal(key, (2, 4, 16, 16), dtype=jnp.float32)

    # 1) Zero-cost pass-through (the recommended implementation of Identity).
    y_fast = identity(x)

    # 2) Materialized copy: single full-array HBM->HBM DMA.
    y_copy = identity_pallas(x)

    # 3) Exercise the multi-chunk (overlapped DMA) path on a slightly larger
    #    tensor by forcing chunking.
    x_chunky = jax.random.normal(key, (16, 4, 16, 32), dtype=jnp.float32)
    y_chunky = identity_pallas(x_chunky, max_inflight_copies=4,
                               min_bytes_per_chunk=0)

    # 4) Ragged / odd shape: DMA handles it directly, no padding or slicing.
    x_ragged = jax.random.normal(key, (2, 5, 7, 9), dtype=jnp.float32)
    y_ragged = identity_pallas(x_ragged)

    # 5) Sub-32-bit dtype: byte-exact copy, no sublane-packing constraints.
    x_bf16 = jax.random.normal(key, (4, 8, 16, 32), dtype=jnp.bfloat16)
    y_bf16 = identity_pallas(x_bf16)

    jax.block_until_ready((y_fast, y_copy, y_chunky, y_ragged, y_bf16))

    assert y_fast.shape == x.shape and y_fast.dtype == x.dtype
    assert y_copy.shape == x.shape and y_copy.dtype == x.dtype
    assert bool(jnp.array_equal(y_fast, x))
    assert bool(jnp.array_equal(y_copy, x))
    assert bool(jnp.array_equal(y_chunky, x_chunky))
    assert bool(jnp.array_equal(y_ragged, x_ragged))
    assert bool(jnp.array_equal(y_bf16, x_bf16))
    print("KERNEL_OK")
</pallas_src>

<mosaic_0001>
module attributes {stable_mosaic.version = 11 : i64} {
  func.func @kernel(%arg0: memref<2x4x16x16xf32, #tpu.memory_space<any>>, %arg1: memref<2x4x16x16xf32, #tpu.memory_space<any>>, %arg2: memref<1x!tpu.dma_semaphore, #tpu.memory_space<semaphore_mem>>) attributes {dimension_semantics = [], scalar_prefetch = 0 : i64, scratch_operands = 1 : i64, tpu.core_type = #tpu.core_type<tc>} {
    %c0_i32 = arith.constant 0 : i32
    %0 = tpu.memref_slice %arg2[%c0_i32] : memref<1x!tpu.dma_semaphore, #tpu.memory_space<semaphore_mem>> -> memref<1x!tpu.dma_semaphore, #tpu.memory_space<semaphore_mem>>
    %1 = tpu.memref_squeeze %0 : memref<1x!tpu.dma_semaphore, #tpu.memory_space<semaphore_mem>> -> memref<!tpu.dma_semaphore, #tpu.memory_space<semaphore_mem>>
    tpu.enqueue_dma source(%arg0 : memref<2x4x16x16xf32, #tpu.memory_space<any>>) target(%arg1 : memref<2x4x16x16xf32, #tpu.memory_space<any>>) target_semaphore(%1 : memref<!tpu.dma_semaphore, #tpu.memory_space<semaphore_mem>>)
    %c0_i32_0 = arith.constant 0 : i32
    %2 = tpu.memref_slice %arg2[%c0_i32_0] : memref<1x!tpu.dma_semaphore, #tpu.memory_space<semaphore_mem>> -> memref<1x!tpu.dma_semaphore, #tpu.memory_space<semaphore_mem>>
    %3 = tpu.memref_squeeze %2 : memref<1x!tpu.dma_semaphore, #tpu.memory_space<semaphore_mem>> -> memref<!tpu.dma_semaphore, #tpu.memory_space<semaphore_mem>>
    tpu.wait_dma2 semaphore(%3 : memref<!tpu.dma_semaphore, #tpu.memory_space<semaphore_mem>>) src(%arg0 : memref<2x4x16x16xf32, #tpu.memory_space<any>>) dst(%arg1 : memref<2x4x16x16xf32, #tpu.memory_space<any>>)
    return
  }
}

</mosaic_0001>

<bundles_post_ra>
// kernel: tpu_custom_call.1
= control target key start
LH: loop header
LB: loop body
LE: loop exit
PB: predicated region body
PF: predicated region fallthrough
CT: control target
= control target key end

     0   :  { %s36_s6 = smov [#allocation2]   ;;  %s37_s7 = smov [#allocation3]   ;;  %s55_s0 = inlined_call_operand.hbm [shape: f32[2,4,16,16], index: 0, kind: input, shape index: {}]   ;;  %s56_s1 = inlined_call_operand.hbm [shape: f32[2,4,16,16], index: 1, kind: output, shape index: {}]  }
   0x1   :  { %s38_s8 = smov 0  }
   0x2   :  { %18 = dma.general %s55_s0, 2048, %s56_s1, %s36_s6, %s37_s7, [#allocation4], %s38_s8, 0  }
   0x3   :  { %34 = dma.done.wait [#allocation2], 2048 }
   0x4   :  { %35 = vsyncadd [#allocation2], 4294965248 }
   0x5   :  { %24 = vsyncmov [#allocation2] }
   0x8   :  { %s25_s13 = vpop.sfrf %24 }
   0x9   :  { %p30_p0 = scmp.ne.s32.totalorder %s25_s13, 0 }
   0xb   :  { %29 = shalt.err (%p30_p0)  }

</bundles_post_ra>
